<compile_context>
chip_gen: v7x
topology: tpu7x:2x2x1
jax: 0.10.0
libtpu: 0.0.40
codegen_flags: <defaults>
</compile_context>

<pallas_src>
import math

import jax
import jax.numpy as jnp
from jax import lax
from jax.experimental import pallas as pl
from jax.experimental.pallas import tpu as pltpu


def _round_up(x, m):
    return ((x + m - 1) // m) * m


def _generator_kernel(x_ref, w_ref, scale_ref, b_ref, o_ref, acc_ref):
    # x_ref: (tm, tk), w_ref: (tv, tk), scale_ref/b_ref: (1, tv)
    # o_ref: (tm, tv), acc_ref: (tm, tv) float32 scratch
    k = pl.program_id(2)

    @pl.when(k == 0)
    def _():
        acc_ref[...] = jnp.zeros_like(acc_ref)

    # Contract last dim of both operands -> MXU-native, no per-tile transpose.
    acc_ref[...] += lax.dot_general(
        x_ref[...],
        w_ref[...],
        dimension_numbers=(((1,), (1,)), ((), ())),
        preferred_element_type=jnp.float32,
    )

    @pl.when(k == pl.num_programs(2) - 1)
    def _():
        o_ref[...] = (
            acc_ref[...] * scale_ref[...] + b_ref[...]
        ).astype(o_ref.dtype)


def _pick_tiles(M, V, H):
    # M tile: multiple of 8 (sublane), target 256 rows of the MXU.
    tm = min(256, _round_up(M, 8))
    # V (output/lane) tile: multiple of 128 (256-aligned helps v6e/v7x), target 512.
    tv = min(512, _round_up(V, 128))
    # K (contraction) tile: multiple of 128, target 512.
    tk = min(512, _round_up(H, 128))
    return tm, tv, tk


def generator_logits(x_flat, weight, bias, col_scale=None, *, tm=None, tv=None, tk=None):
    """x_flat: (M, H), weight: (V, H), bias: (V,), col_scale: optional (V,).

    Returns (M, V) logits = (x_flat @ weight.T) * col_scale + bias.
    """
    M, H = x_flat.shape
    V, H2 = weight.shape
    assert H == H2, "hidden-size mismatch between activations and weight"

    if col_scale is None:
        col_scale = jnp.ones((V,), jnp.float32)

    dtm, dtv, dtk = _pick_tiles(M, V, H)
    tm = dtm if tm is None else tm
    tv = dtv if tv is None else tv
    tk = dtk if tk is None else tk

    Mp, Vp, Hp = _round_up(M, tm), _round_up(V, tv), _round_up(H, tk)

    xp = x_flat if (Mp == M and Hp == H) else jnp.pad(x_flat, ((0, Mp - M), (0, Hp - H)))
    wp = weight if (Vp == V and Hp == H) else jnp.pad(weight, ((0, Vp - V), (0, Hp - H)))
    bp = (bias if Vp == V else jnp.pad(bias, (0, Vp - V))).reshape(1, Vp)
    sp = (col_scale if Vp == V else jnp.pad(col_scale, (0, Vp - V))).reshape(1, Vp)

    grid = (Mp // tm, Vp // tv, Hp // tk)

    out = pl.pallas_call(
        _generator_kernel,
        out_shape=jax.ShapeDtypeStruct((Mp, Vp), x_flat.dtype),
        grid_spec=pltpu.PrefetchScalarGridSpec(
            num_scalar_prefetch=0,
            grid=grid,
            in_specs=[
                pl.BlockSpec((tm, tk), lambda i, j, k: (i, k)),   # hidden tile
                pl.BlockSpec((tv, tk), lambda i, j, k: (j, k)),   # weight tile (V x H)
                pl.BlockSpec((1, tv), lambda i, j, k: (0, j)),    # column scale (fix_norm)
                pl.BlockSpec((1, tv), lambda i, j, k: (0, j)),    # bias tile
            ],
            out_specs=pl.BlockSpec((tm, tv), lambda i, j, k: (i, j)),
            scratch_shapes=[pltpu.VMEM((tm, tv), jnp.float32)],
        ),
        compiler_params=pltpu.CompilerParams(
            dimension_semantics=("parallel", "parallel", "arbitrary"),
            vmem_limit_bytes=48 * 1024 * 1024,
        ),
        cost_estimate=pl.CostEstimate(
            flops=2 * M * V * H,
            transcendentals=0,
            bytes_accessed=4 * (M * H + V * H + 2 * V + M * V),
        ),
    )(xp, wp, sp, bp)

    if Mp != M or Vp != V:
        out = out[:M, :V]
    return out


class Generator:
    """JAX/Pallas re-implementation of onmt Generator."""

    def __init__(self, hidden_size, output_size, fix_norm=False, key=None):
        self.hidden_size = hidden_size
        self.output_size = output_size
        self.fix_norm = fix_norm
        self.must_softmax = False
        if key is None:
            key = jax.random.PRNGKey(0)
        stdv = 1.0 / math.sqrt(hidden_size)
        # nn.Linear weight shape: (output_size, hidden_size), uniform(-stdv, stdv)
        self.weight = jax.random.uniform(
            key, (output_size, hidden_size), jnp.float32, minval=-stdv, maxval=stdv
        )
        self.bias = jnp.zeros((output_size,), jnp.float32)

    def forward(self, output_dicts):
        hidden = output_dicts["hidden"]          # (T, B, H)
        _ = output_dicts["target_mask"]          # unused by forward (parity with torch)

        if self.fix_norm:
            # F.normalize(W, dim=-1) == W / max(||W_row||, 1e-12).
            # Instead of materializing a normalized (V, H) copy of W in HBM,
            # pass a (V,) inverse-norm vector and scale logits column-wise
            # inside the kernel epilogue (mathematically identical).
            norm = jnp.sqrt(jnp.sum(self.weight * self.weight, axis=-1))
            col_scale = 1.0 / jnp.maximum(norm, 1e-12)
        else:
            col_scale = None

        T, B, H = hidden.shape
        x_flat = hidden.reshape(T * B, H)
        logits = generator_logits(x_flat, self.weight, self.bias, col_scale)
        logits = logits.reshape(T, B, self.output_size)

        output_dicts["logits"] = logits
        output_dicts["softmaxed"] = self.must_softmax
        return output_dicts


if __name__ == "__main__":
    # Small shapes consistent with the module: seq=8, batch=2, hidden=32, vocab=128
    T, B, H, V = 8, 2, 32, 128
    key = jax.random.PRNGKey(0)
    k_hidden, k_param = jax.random.split(key)

    hidden = jax.random.normal(k_hidden, (T, B, H), jnp.float32)
    target_mask = jnp.ones((T, B), jnp.float32)

    # Plain linear path
    gen = Generator(H, V, fix_norm=False, key=k_param)
    out = gen.forward({"hidden": hidden, "target_mask": target_mask})
    logits = jax.block_until_ready(out["logits"])

    ref = (hidden.reshape(T * B, H) @ gen.weight.T + gen.bias).reshape(T, B, V)
    assert logits.shape == (T, B, V)
    assert jnp.allclose(logits, ref, atol=1e-5, rtol=1e-5)

    # fix_norm path
    gen_fn = Generator(H, V, fix_norm=True, key=k_param)
    out_fn = gen_fn.forward({"hidden": hidden, "target_mask": target_mask})
    logits_fn = jax.block_until_ready(out_fn["logits"])

    wn = gen_fn.weight / jnp.maximum(
        jnp.sqrt(jnp.sum(gen_fn.weight * gen_fn.weight, axis=-1, keepdims=True)), 1e-12
    )
    ref_fn = (hidden.reshape(T * B, H) @ wn.T + gen_fn.bias).reshape(T, B, V)
    assert jnp.allclose(logits_fn, ref_fn, atol=1e-5, rtol=1e-5)

    # Odd, non-tile-aligned shapes (exercise padding path)
    T2, B2, H2, V2 = 5, 3, 40, 200
    hidden2 = jax.random.normal(jax.random.PRNGKey(2), (T2, B2, H2), jnp.float32)
    gen2 = Generator(H2, V2, fix_norm=False, key=jax.random.PRNGKey(3))
    out2 = gen2.forward({"hidden": hidden2, "target_mask": jnp.ones((T2, B2))})
    logits2 = jax.block_until_ready(out2["logits"])
    ref2 = (hidden2.reshape(T2 * B2, H2) @ gen2.weight.T + gen2.bias).reshape(T2, B2, V2)
    assert jnp.allclose(logits2, ref2, atol=1e-5, rtol=1e-5)

    print("KERNEL_OK")
</pallas_src>

<mosaic_0001>
module attributes {stable_mosaic.version = 11 : i64} {
  func.func @_generator_kernel(%arg0: i32, %arg1: i32, %arg2: i32, %arg3: memref<16x128xf32, #tpu.memory_space<vmem>>, %arg4: memref<128x128xf32, #tpu.memory_space<vmem>>, %arg5: memref<1x128xf32, #tpu.memory_space<vmem>>, %arg6: memref<1x128xf32, #tpu.memory_space<vmem>>, %arg7: memref<16x128xf32, #tpu.memory_space<vmem>>, %arg8: memref<16x128xf32, #tpu.memory_space<vmem>>) attributes {dimension_semantics = [#tpu.dimension_semantics<parallel>, #tpu.dimension_semantics<parallel>, #tpu.dimension_semantics<arbitrary>], iteration_bounds = array<i64: 1, 1, 1>, scalar_prefetch = 0 : i64, scratch_operands = 1 : i64, tpu.core_type = #tpu.core_type<tc>, window_params = [{transform_indices = @transform_0, window_bounds = array<i64: 16, 128>}, {transform_indices = @transform_1, window_bounds = array<i64: 128, 128>}, {transform_indices = @transform_2, window_bounds = array<i64: 1, 128>}, {transform_indices = @transform_3, window_bounds = array<i64: 1, 128>}, {transform_indices = @transform_4, window_bounds = array<i64: 16, 128>}]} {
    %c0_i32 = arith.constant 0 : i32
    %0 = arith.cmpi eq, %arg2, %c0_i32 : i32
    %1 = arith.extui %0 : i1 to i32
    %c0_i32_0 = arith.constant 0 : i32
    %2 = arith.cmpi ne, %1, %c0_i32_0 : i32
    scf.if %2 {
      %cst_10 = arith.constant 0.000000e+00 : f32
      %12 = vector.broadcast %cst_10 : f32 to vector<16x128xf32>
      %c0_11 = arith.constant 0 : index
      %c0_12 = arith.constant 0 : index
      %13 = vector.load %arg8[%c0_11, %c0_12] : memref<16x128xf32, #tpu.memory_space<vmem>>, vector<16x128xf32>
      tpu.vector_store %arg8[%c0_11, %c0_12], %12 {strides = array<i32>} : memref<16x128xf32, #tpu.memory_space<vmem>>, vector<16x128xf32>,
    } else {
    }
    %c0 = arith.constant 0 : index
    %c0_1 = arith.constant 0 : index
    %3 = vector.load %arg8[%c0, %c0_1] : memref<16x128xf32, #tpu.memory_space<vmem>>, vector<16x128xf32>
    %c0_2 = arith.constant 0 : index
    %c0_3 = arith.constant 0 : index
    %4 = vector.load %arg3[%c0_2, %c0_3] : memref<16x128xf32, #tpu.memory_space<vmem>>, vector<16x128xf32>
    %c0_4 = arith.constant 0 : index
    %c0_5 = arith.constant 0 : index
    %5 = vector.load %arg4[%c0_4, %c0_5] : memref<128x128xf32, #tpu.memory_space<vmem>>, vector<128x128xf32>
    %cst = arith.constant dense<0.000000e+00> : vector<16x128xf32>
    %6 = tpu.matmul %4, %5, %cst {dimension_numbers = #tpu.dot_dimension_numbers<[1], [1], [0], [0], [0, 0, 1, 0], [], []>} : vector<16x128xf32>, vector<128x128xf32>, vector<16x128xf32> -> vector<16x128xf32>
    %7 = arith.addf %3, %6 : vector<16x128xf32>
    %c0_6 = arith.constant 0 : index
    %c0_7 = arith.constant 0 : index
    %8 = vector.load %arg8[%c0_6, %c0_7] : memref<16x128xf32, #tpu.memory_space<vmem>>, vector<16x128xf32>
    tpu.vector_store %arg8[%c0_6, %c0_7], %7 {strides = array<i32>} : memref<16x128xf32, #tpu.memory_space<vmem>>, vector<16x128xf32>,
    %c0_i32_8 = arith.constant 0 : i32
    %9 = arith.cmpi eq, %arg2, %c0_i32_8 : i32
    %10 = arith.extui %9 : i1 to i32
    %c0_i32_9 = arith.constant 0 : i32
    %11 = arith.cmpi ne, %10, %c0_i32_9 : i32
    scf.if %11 {
      %c0_10 = arith.constant 0 : index
      %c0_11 = arith.constant 0 : index
      %12 = vector.load %arg8[%c0_10, %c0_11] : memref<16x128xf32, #tpu.memory_space<vmem>>, vector<16x128xf32>
      %c0_12 = arith.constant 0 : index
      %c0_13 = arith.constant 0 : index
      %13 = vector.load %arg5[%c0_12, %c0_13] : memref<1x128xf32, #tpu.memory_space<vmem>>, vector<1x128xf32>
      %14 = vector.broadcast %13 : vector<1x128xf32> to vector<16x128xf32>
      %15 = arith.mulf %12, %14 : vector<16x128xf32>
      %c0_14 = arith.constant 0 : index
      %c0_15 = arith.constant 0 : index
      %16 = vector.load %arg6[%c0_14, %c0_15] : memref<1x128xf32, #tpu.memory_space<vmem>>, vector<1x128xf32>
      %17 = vector.broadcast %16 : vector<1x128xf32> to vector<16x128xf32>
      %18 = arith.addf %15, %17 : vector<16x128xf32>
      %c0_16 = arith.constant 0 : index
      %c0_17 = arith.constant 0 : index
      %19 = vector.load %arg7[%c0_16, %c0_17] : memref<16x128xf32, #tpu.memory_space<vmem>>, vector<16x128xf32>
      tpu.vector_store %arg7[%c0_16, %c0_17], %18 {strides = array<i32>} : memref<16x128xf32, #tpu.memory_space<vmem>>, vector<16x128xf32>,
    } else {
    }
    return
  }
  func.func @transform_0(%arg0: i32, %arg1: i32, %arg2: i32) -> (i32, i32) {
    %c0_i32 = arith.constant 0 : i32
    return %arg0, %arg2 : i32, i32
  }
  func.func @transform_1(%arg0: i32, %arg1: i32, %arg2: i32) -> (i32, i32) {
    %c0_i32 = arith.constant 0 : i32
    return %arg1, %arg2 : i32, i32
  }
  func.func @transform_2(%arg0: i32, %arg1: i32, %arg2: i32) -> (i32, i32) {
    %c0_i32 = arith.constant 0 : i32
    %c0_i32_0 = arith.constant 0 : i32
    return %c0_i32, %arg1 : i32, i32
  }
  func.func @transform_3(%arg0: i32, %arg1: i32, %arg2: i32) -> (i32, i32) {
    %c0_i32 = arith.constant 0 : i32
    %c0_i32_0 = arith.constant 0 : i32
    return %c0_i32, %arg1 : i32, i32
  }
  func.func @transform_4(%arg0: i32, %arg1: i32, %arg2: i32) -> (i32, i32) {
    %c0_i32 = arith.constant 0 : i32
    return %arg0, %arg1 : i32, i32
  }
}

</mosaic_0001>

<bundles_post_ra>
// kernel: tpu_custom_call.1
= control target key start
LH: loop header
LB: loop body
LE: loop exit
PB: predicated region body
PF: predicated region fallthrough
CT: control target
= control target key end

     0   :  { %9 = vsyncpa [#allocation4], 0  ;;  %s439_s0 = inlined_call_operand.hbm [shape: f32[16,128], index: 0, kind: input, shape index: {}]   ;;  %s440_s1 = inlined_call_operand.hbm [shape: f32[128,128], index: 1, kind: input, shape index: {}]   ;;  %s441_s2 = inlined_call_operand.vmem [shape: f32[1,128], index: 2, kind: input, shape index: {}]   ;;  %s442_s3 = inlined_call_operand.vmem [shape: f32[1,128], index: 3, kind: input, shape index: {}]   ;;  %s443_s4 = inlined_call_operand.hbm [shape: f32[16,128], index: 4, kind: output, shape index: {}]  }
   0x1   :  { %10 = vsyncpa [#allocation7], 0 }
   0x2   :  { %11 = vsyncpa [#allocation5], 0  ;;  %s358_s15 = smov [#allocation3]   ;;  %s286_s19 = scalar_lea.hbm %s439_s0, 256 }
   0x3   :  { %s17_s16 = sshll.u32 %s358_s15, 4  ;;  %p287_p0 = scmp.ne.s32.totalorder %s439_s0, %s286_s19  ;;  %s18_s16 = int_to_ptr.vmem [resolvable:$true] %s17_s16 }
   0x4   :  { %p290_p1 = scmp.lt.u32.totalorder %s286_s19, %s439_s0 }
   0x6   :  { %p292_p2 = pnand %p290_p1, %p287_p0 }
   0x8   :  { %295 = shalt.err (!%p292_p2)
}
   0x9   :  { %s296_s24 = scalar_lea.vmem %s18_s16, 256  ;;  %p301_p4 = scmp.lt.s32.totalorder %s18_s16, %s18_s16 }
   0xa   :  { %p297_p3 = scmp.ne.s32.totalorder %s18_s16, %s296_s24  ;;  %p302_p5 = scmp.lt.s32.totalorder %s296_s24, %s296_s24 }
   0xc   :  { %p303_p6 = por %p302_p5, %p301_p4 }
   0xe   :  { %p304_p7 = pnand %p303_p6, %p297_p3 }
  0x10   :  { %307 = shalt.err (!%p304_p7)
}
  0x11   :  { %s359_s25 = smov 128   ;;  %s360_s26 = smov 8  }
  0x12   :  { %23 = dma.hbm_to_vmem [thread:$0]  %s439_s0, 256, %s18_s16, [#allocation4], %s359_s25, %s359_s25, %s360_s26  }
  0x13   :  { %s361_s29 = smov [#allocation6]   ;;  %s308_s7 = scalar_lea.hbm %s440_s1, 2048 }
  0x14   :  { %s29_s30 = sshll.u32 %s361_s29, 4  ;;  %p309_p8 = scmp.ne.s32.totalorder %s440_s1, %s308_s7  ;;  %s30_s30 = int_to_ptr.vmem [resolvable:$true] %s29_s30 }
  0x15   :  { %p312_p9 = scmp.lt.u32.totalorder %s308_s7, %s440_s1 }
  0x17   :  { %p314_p10 = pnand %p312_p9, %p309_p8 }
  0x19   :  { %317 = shalt.err (!%p314_p10)
}
  0x1a   :  { %s318_s12 = scalar_lea.vmem %s30_s30, 2048  ;;  %p323_p12 = scmp.lt.s32.totalorder %s30_s30, %s30_s30 }
  0x1b   :  { %p319_p11 = scmp.ne.s32.totalorder %s30_s30, %s318_s12  ;;  %p324_p13 = scmp.lt.s32.totalorder %s318_s12, %s318_s12 }
  0x1d   :  { %p325_p0 = por %p324_p13, %p323_p12 }
  0x1f   :  { %p326_p1 = pnand %p325_p0, %p319_p11 }
  0x21   :  { %329 = shalt.err (!%p326_p1)
}
  0x22   :  { %35 = dma.hbm_to_vmem [thread:$0]  %s440_s1, 2048, %s30_s30, [#allocation7], %s359_s25, %s359_s25, %s360_s26  }
  0x23   :  { %352 = dma.done.wait [#allocation4], 256  }
  0x24   :  { %353 = vsyncadd [#allocation4], 4294967040 }
  0x25   :  { %354 = dma.done.wait [#allocation7], 2048  }
  0x26   :  { %355 = vsyncadd [#allocation7], 4294965248  ;;  %v56_v0 = vld [vmem:[#allocation6] sm:$0xff]  ;;  %v57_v1 = vld [vmem:[#allocation6 + $0x8] sm:$0xff]  ;;  %s362_s17 = smov [#allocation8]  }
  0x27   :  { %v58_v2 = vld [vmem:[#allocation6 + $0x10] sm:$0xff]  ;;  %v249_v3 = vpack.c.bf16 %v57_v1, %v56_v0  ;;  %v59_v4 = vld [vmem:[#allocation6 + $0x18] sm:$0xff]  ;;  %v60_v7 = vld [vmem:[#allocation6 + $0x20] sm:$0xff]  ;;  %s181_s18 = sshll.u32 %s362_s17, 4  ;;  %s182_s18 = int_to_ptr.vmem [resolvable:$true] %s181_s18 }
  0x28   :  { %v253_v5 = vpack.c.bf16 %v59_v4, %v58_v2  ;;  %v54_v6 = vld [vmem:[#allocation3] sm:$0xff]  ;;  %v61_v8 = vld [vmem:[#allocation6 + $0x28] sm:$0xff]  ;;  %v63_v11 = vld [vmem:[#allocation6 + $0x38] sm:$0xff]  ;;  %s330_s19 = scalar_lea.vmem %s182_s18, 256  ;;  %p335_p3 = scmp.lt.s32.totalorder %s182_s18, %s182_s18 }
  0x29   :  { %250 = vmatprep.subr.bf16.mxu0 %v249_v3  ;;  %246 = vmatprep.mubr.f32.mxu0 %v54_v6  ;;  %v257_v9 = vpack.c.bf16 %v61_v8, %v60_v7  ;;  %v62_v10 = vld [vmem:[#allocation6 + $0x30] sm:$0xff]  ;;  %v64_v13 = vld [vmem:[#allocation6 + $0x40] sm:$0xff]  ;;  %v65_v14 = vld [vmem:[#allocation6 + $0x48] sm:$0xff]  ;;  %p331_p2 = scmp.ne.s32.totalorder %s182_s18, %s330_s19  ;;  %p336_p4 = scmp.lt.s32.totalorder %s330_s19, %s330_s19 }
  0x2a   :  { %252 = vmatpush3.bf16.xpose.msra.mxu0 %v249_v3  ;;  %v261_v12 = vpack.c.bf16 %v63_v11, %v62_v10  ;;  %v265_v15 = vpack.c.bf16 %v65_v14, %v64_v13  ;;  %v66_v16 = vld [vmem:[#allocation6 + $0x50] sm:$0xff]  ;;  %v67_v17 = vld [vmem:[#allocation6 + $0x58] sm:$0xff]  ;;  %v68_v19 = vld [vmem:[#allocation6 + $0x60] sm:$0xff] }
  0x2b   :  { %254 = vmatprep.subr.bf16.mxu0 %v253_v5  ;;  %v269_v18 = vpack.c.bf16 %v67_v17, %v66_v16  ;;  %v69_v20 = vld [vmem:[#allocation6 + $0x68] sm:$0xff]  ;;  %v70_v22 = vld [vmem:[#allocation6 + $0x70] sm:$0xff]  ;;  %v71_v23 = vld [vmem:[#allocation6 + $0x78] sm:$0xff]  ;;  %p337_p5 = por %p336_p4, %p335_p3 }
  0x2c   :  { %v273_v21 = vpack.c.bf16 %v69_v20, %v68_v19  ;;  %v277_v24 = vpack.c.bf16 %v71_v23, %v70_v22  ;;  %v55_v25 = vld [vmem:[#allocation3 + $0x8] sm:$0xff]  ;;  %v194_v26 = vld [vmem:[%s441_s2] ss:$0 sm:$0xff] }
  0x2d   :  { %v195_v28 = vld [vmem:[%s442_s3] ss:$0 sm:$0xff]  ;;  %p338_p6 = pnand %p337_p5, %p331_p2 }
  0x32   :  { %256 = vmatpush3.bf16.xpose.msra.mxu0 %v253_v5 }
  0x33   :  { %258 = vmatprep.subr.bf16.mxu0 %v257_v9 }
  0x3a   :  { %260 = vmatpush3.bf16.xpose.msra.mxu0 %v257_v9 }
  0x3b   :  { %262 = vmatprep.subr.bf16.mxu0 %v261_v12 }
  0x42   :  { %264 = vmatpush3.bf16.xpose.msra.mxu0 %v261_v12 }
  0x43   :  { %266 = vmatprep.subr.bf16.mxu0 %v265_v15 }
  0x4a   :  { %268 = vmatpush3.bf16.xpose.msra.mxu0 %v265_v15 }
  0x4b   :  { %270 = vmatprep.subr.bf16.mxu0 %v269_v18 }
  0x52   :  { %272 = vmatpush3.bf16.xpose.msra.mxu0 %v269_v18 }
  0x53   :  { %274 = vmatprep.subr.bf16.mxu0 %v273_v21 }
  0x5a   :  { %276 = vmatpush3.bf16.xpose.msra.mxu0 %v273_v21 }
  0x5b   :  { %278 = vmatprep.subr.bf16.mxu0 %v277_v24 }
  0x62   :  { %280 = vmatpush3.bf16.xpose.msra.mxu0 %v277_v24 }
  0x69   :  { %247 = vmatmul.mubr.f32.vlgmr.msra.gmra.mrb[0].mxu0 %v55_v25 }
 0x13c   :  { %v248_v27 = vpop.f32.mrb[0].mxu0 }
 0x13d   :  { %v164_v29 = vmul.f32 %v248_v27, %v194_v26  ;;  %v138_v30 = vpop.f32.mrb[1].mxu0 }
 0x13e   :  { %v163_v31 = vmul.f32 %v194_v26, %v138_v30 }
 0x13f   :  { %v173_v32 = vadd.f32 %v195_v28, %v164_v29 }
 0x140   :  { %v172_v33 = vadd.f32 %v195_v28, %v163_v31 }
 0x141   :  { %175 = vst [vmem:[#allocation8 + $0x8] sm:$0xff] %v173_v32 }
 0x142   :  { %174 = vst [vmem:[#allocation8] sm:$0xff] %v172_v33 }
 0x143   :  { %341 = shalt.err (!%p338_p6)
}
 0x144   :  { %s342_s3 = scalar_lea.hbm %s443_s4, 256 }
 0x145   :  { %p343_p7 = scmp.ne.s32.totalorder %s443_s4, %s342_s3  ;;  %p346_p8 = scmp.lt.u32.totalorder %s342_s3, %s443_s4 }
 0x147   :  { %p348_p9 = pnand %p346_p8, %p343_p7 }
 0x149   :  { %351 = shalt.err (!%p348_p9)
}
 0x14a   :  { %187 = dma.vmem_to_hbm [thread:$0]  %s182_s18, 256, %s443_s4, [#allocation5], %s359_s25, %s359_s25, %s360_s26  }
 0x14b   :  { %356 = dma.done.wait [#allocation5], 256  }
 0x14c   :  { %357 = vsyncadd [#allocation5], 4294967040 }
 0x14d   :  { %191 = vsyncpa [#allocation4], 1 }
 0x14e   :  { %192 = vsyncpa [#allocation7], 1 }
 0x14f   :  { %193 = vsyncpa [#allocation5], 1 }

</bundles_post_ra>
